<compile_context>
chip_gen: v7x
topology: tpu7x:2x2x1
jax: 0.10.0
libtpu: 0.0.40
codegen_flags: <defaults>
</compile_context>

<pallas_src>
import functools

import jax
import jax.numpy as jnp
from jax.experimental import pallas as pl
from jax.experimental.pallas import tpu as pltpu


def _round_up(n, m):
    return ((n + m - 1) // m) * m


def _actor_kernel(x_ref,
                  w1_ref, b1_ref,
                  w2_ref, b2_ref,
                  wh_ref, bh_ref,
                  out_ref,
                  *, action_dim):
    """Fused MLP forward: 2x (Linear+ReLU) trunk, then one fused head matmul.

    Output layout: columns [0:A] = mean, [A:2A] = clamped log_std, rest = zero pad.
    """
    x = x_ref[...]

    # Layer 1: Linear(obs -> hidden) + ReLU  (MXU matmul, VPU max)
    h1 = jnp.dot(x, w1_ref[...], preferred_element_type=jnp.float32) + b1_ref[...]
    h1 = jnp.maximum(h1, 0.0)

    # Layer 2: Linear(hidden -> hidden) + ReLU
    h2 = jnp.dot(h1, w2_ref[...], preferred_element_type=jnp.float32) + b2_ref[...]
    h2 = jnp.maximum(h2, 0.0)

    # Fused heads: one matmul producing [mean | log_std | pad] columns.
    y = jnp.dot(h2, wh_ref[...], preferred_element_type=jnp.float32) + bh_ref[...]

    # Clamp only the log_std columns (col >= A). Pad columns are zero and stay
    # zero under the clamp, so the mask can be a single compare.
    col = jax.lax.broadcasted_iota(jnp.int32, y.shape, dimension=1)
    y = jnp.where(col >= action_dim, jnp.clip(y, -20.0, 2.0), y)

    out_ref[...] = y.astype(out_ref.dtype)


def pack_actor_params(params):
    """Fuse head weights and zero-pad everything to lane/sublane friendly sizes.

    Returns (packed_params, action_dim). Do this ONCE outside the hot loop.
    """
    w1, b1 = params["w1"], params["b1"]
    w2, b2 = params["w2"], params["b2"]
    wm, bm = params["wm"], params["bm"]
    wl, bl = params["wl"], params["bl"]

    obs, hid = w1.shape
    act = wm.shape[1]

    obs_p = _round_up(obs, 8)
    hid_p = _round_up(hid, 128)
    head_p = _round_up(2 * act, 128)

    def pad2(a, rows, cols):
        return jnp.pad(a, ((0, rows - a.shape[0]), (0, cols - a.shape[1])))

    wh = jnp.concatenate([wm, wl], axis=1)   # (H, 2A): [mean | log_std]
    bh = jnp.concatenate([bm, bl], axis=1)   # (1, 2A)

    packed = dict(
        w1=pad2(w1, obs_p, hid_p), b1=pad2(b1, 1, hid_p),
        w2=pad2(w2, hid_p, hid_p), b2=pad2(b2, 1, hid_p),
        wh=pad2(wh, hid_p, head_p), bh=pad2(bh, 1, head_p),
    )
    return packed, act


@functools.partial(jax.jit, static_argnames=("action_dim",))
def actor_forward(x, packed, action_dim):
    """Runs the fused Actor forward in a single batch-tiled pallas_call.

    x: (B, obs_dim) float32; packed: output of pack_actor_params.
    returns: (mean (B, A), log_std (B, A))
    """
    B, obs = x.shape
    obs_p, hid_p = packed["w1"].shape
    head_p = packed["wh"].shape[1]

    # Batch tile: multiple of 8 sublanes; 256 amortizes per-step overhead while
    # staying far under VMEM limits on all generations (incl. v7x's 64 MiB).
    TB = min(256, _round_up(B, 8))
    B_p = _round_up(B, TB)

    x_p = x
    if (B_p != B) or (obs_p != obs):
        x_p = jnp.pad(x, ((0, B_p - B), (0, obs_p - obs)))

    flops = 2 * B_p * (obs_p * hid_p + hid_p * hid_p + hid_p * head_p)
    bytes_accessed = 4 * (B_p * obs_p + B_p * head_p
                          + obs_p * hid_p + hid_p * hid_p + hid_p * head_p
                          + 2 * hid_p + head_p)

    kernel = functools.partial(_actor_kernel, action_dim=action_dim)

    out = pl.pallas_call(
        kernel,
        out_shape=jax.ShapeDtypeStruct((B_p, head_p), jnp.float32),
        grid_spec=pltpu.PrefetchScalarGridSpec(
            num_scalar_prefetch=0,
            grid=(B_p // TB,),
            in_specs=[
                pl.BlockSpec((TB, obs_p), lambda i: (i, 0)),      # x: tiled over batch
                pl.BlockSpec((obs_p, hid_p), lambda i: (0, 0)),   # weights/biases stay
                pl.BlockSpec((1, hid_p), lambda i: (0, 0)),       # VMEM-resident across
                pl.BlockSpec((hid_p, hid_p), lambda i: (0, 0)),   # grid steps (constant
                pl.BlockSpec((1, hid_p), lambda i: (0, 0)),       # block index)
                pl.BlockSpec((hid_p, head_p), lambda i: (0, 0)),
                pl.BlockSpec((1, head_p), lambda i: (0, 0)),
            ],
            out_specs=pl.BlockSpec((TB, head_p), lambda i: (i, 0)),
        ),
        compiler_params=pltpu.CompilerParams(
            dimension_semantics=("parallel",)),   # megacore sharding on v7x
        cost_estimate=pl.CostEstimate(
            flops=flops, transcendentals=0, bytes_accessed=bytes_accessed),
    )(x_p, packed["w1"], packed["b1"], packed["w2"], packed["b2"],
      packed["wh"], packed["bh"])

    mean = out[:B, :action_dim]
    log_std = out[:B, action_dim:2 * action_dim]
    return mean, log_std


def init_actor_params(key, obs_dim, action_dim, hidden_dim=128):
    """Deterministic init mimicking PyTorch nn.Linear default (U[-1/sqrt(fan_in), 1/sqrt(fan_in)])."""
    def linear(key, fan_in, fan_out):
        kw, kb = jax.random.split(key)
        bound = 1.0 / jnp.sqrt(jnp.float32(fan_in))
        w = jax.random.uniform(kw, (fan_in, fan_out), jnp.float32, -bound, bound)
        b = jax.random.uniform(kb, (1, fan_out), jnp.float32, -bound, bound)
        return w, b

    k1, k2, k3, k4 = jax.random.split(key, 4)
    w1, b1 = linear(k1, obs_dim, hidden_dim)
    w2, b2 = linear(k2, hidden_dim, hidden_dim)
    wm, bm = linear(k3, hidden_dim, action_dim)
    wl, bl = linear(k4, hidden_dim, action_dim)
    return dict(w1=w1, b1=b1, w2=w2, b2=b2, wm=wm, bm=bm, wl=wl, bl=bl)


def actor_forward_ref(x, p):
    """Pure-JAX reference for correctness checking (unpadded params)."""
    h1 = jnp.maximum(x @ p["w1"] + p["b1"], 0.0)
    h2 = jnp.maximum(h1 @ p["w2"] + p["b2"], 0.0)
    mean = h2 @ p["wm"] + p["bm"]
    log_std = jnp.clip(h2 @ p["wl"] + p["bl"], -20.0, 2.0)
    return mean, log_std


if __name__ == "__main__":
    # Small shapes consistent with a SAC Actor: batch=8, obs_dim=16, action_dim=4, hidden=32
    B, OBS, ACT, HID = 8, 16, 4, 32

    key = jax.random.PRNGKey(0)
    kx, kp = jax.random.split(key)
    x = jax.random.normal(kx, (B, OBS), jnp.float32)
    params = init_actor_params(kp, OBS, ACT, hidden_dim=HID)

    packed, action_dim = pack_actor_params(params)
    mean, log_std = actor_forward(x, packed, action_dim)
    jax.block_until_ready((mean, log_std))

    mean_ref, log_std_ref = actor_forward_ref(x, params)
    assert mean.shape == (B, ACT) and log_std.shape == (B, ACT)
    assert jnp.allclose(mean, mean_ref, atol=1e-5, rtol=1e-5)
    assert jnp.allclose(log_std, log_std_ref, atol=1e-5, rtol=1e-5)
    assert float(jnp.max(log_std)) <= 2.0 and float(jnp.min(log_std)) >= -20.0

    # TODO(synk): sample()/_log_prob_tanh need RNG + tanh log-prob; only forward() is kernelized here.
    print("KERNEL_OK")
</pallas_src>

<mosaic_0001>
module attributes {stable_mosaic.version = 11 : i64} {
  func.func @_actor_kernel(%arg0: i32, %arg1: memref<8x16xf32, #tpu.memory_space<vmem>>, %arg2: memref<16x128xf32, #tpu.memory_space<vmem>>, %arg3: memref<1x128xf32, #tpu.memory_space<vmem>>, %arg4: memref<128x128xf32, #tpu.memory_space<vmem>>, %arg5: memref<1x128xf32, #tpu.memory_space<vmem>>, %arg6: memref<128x128xf32, #tpu.memory_space<vmem>>, %arg7: memref<1x128xf32, #tpu.memory_space<vmem>>, %arg8: memref<8x128xf32, #tpu.memory_space<vmem>>) attributes {dimension_semantics = [#tpu.dimension_semantics<parallel>], iteration_bounds = array<i64: 1>, scalar_prefetch = 0 : i64, scratch_operands = 0 : i64, tpu.core_type = #tpu.core_type<tc>, window_params = [{transform_indices = @transform_0, window_bounds = array<i64: 8, 16>}, {pipeline_mode = #tpu.pipeline_mode<synchronous>, transform_indices = @transform_1, window_bounds = array<i64: 16, 128>}, {pipeline_mode = #tpu.pipeline_mode<synchronous>, transform_indices = @transform_2, window_bounds = array<i64: 1, 128>}, {pipeline_mode = #tpu.pipeline_mode<synchronous>, transform_indices = @transform_3, window_bounds = array<i64: 128, 128>}, {pipeline_mode = #tpu.pipeline_mode<synchronous>, transform_indices = @transform_4, window_bounds = array<i64: 1, 128>}, {pipeline_mode = #tpu.pipeline_mode<synchronous>, transform_indices = @transform_5, window_bounds = array<i64: 128, 128>}, {pipeline_mode = #tpu.pipeline_mode<synchronous>, transform_indices = @transform_6, window_bounds = array<i64: 1, 128>}, {transform_indices = @transform_7, window_bounds = array<i64: 8, 128>}]} {
    %c0 = arith.constant 0 : index
    %c0_0 = arith.constant 0 : index
    %0 = vector.load %arg1[%c0, %c0_0] : memref<8x16xf32, #tpu.memory_space<vmem>>, vector<8x16xf32>
    %c0_1 = arith.constant 0 : index
    %c0_2 = arith.constant 0 : index
    %1 = vector.load %arg2[%c0_1, %c0_2] : memref<16x128xf32, #tpu.memory_space<vmem>>, vector<16x128xf32>
    %cst = arith.constant dense<0.000000e+00> : vector<8x128xf32>
    %2 = tpu.matmul %0, %1, %cst {dimension_numbers = #tpu.dot_dimension_numbers<[1], [0], [0], [1], [0, 0, 1, 1], [], []>} : vector<8x16xf32>, vector<16x128xf32>, vector<8x128xf32> -> vector<8x128xf32>
    %c0_3 = arith.constant 0 : index
    %c0_4 = arith.constant 0 : index
    %3 = vector.load %arg3[%c0_3, %c0_4] : memref<1x128xf32, #tpu.memory_space<vmem>>, vector<1x128xf32>
    %4 = vector.broadcast %3 : vector<1x128xf32> to vector<8x128xf32>
    %5 = arith.addf %2, %4 : vector<8x128xf32>
    %cst_5 = arith.constant 0.000000e+00 : f32
    %6 = vector.broadcast %cst_5 : f32 to vector<8x128xf32>
    %7 = arith.maximumf %5, %6 : vector<8x128xf32>
    %c0_6 = arith.constant 0 : index
    %c0_7 = arith.constant 0 : index
    %8 = vector.load %arg4[%c0_6, %c0_7] : memref<128x128xf32, #tpu.memory_space<vmem>>, vector<128x128xf32>
    %cst_8 = arith.constant dense<0.000000e+00> : vector<8x128xf32>
    %9 = tpu.matmul %7, %8, %cst_8 {dimension_numbers = #tpu.dot_dimension_numbers<[1], [0], [0], [1], [0, 0, 1, 1], [], []>} : vector<8x128xf32>, vector<128x128xf32>, vector<8x128xf32> -> vector<8x128xf32>
    %c0_9 = arith.constant 0 : index
    %c0_10 = arith.constant 0 : index
    %10 = vector.load %arg5[%c0_9, %c0_10] : memref<1x128xf32, #tpu.memory_space<vmem>>, vector<1x128xf32>
    %11 = vector.broadcast %10 : vector<1x128xf32> to vector<8x128xf32>
    %12 = arith.addf %9, %11 : vector<8x128xf32>
    %cst_11 = arith.constant 0.000000e+00 : f32
    %13 = vector.broadcast %cst_11 : f32 to vector<8x128xf32>
    %14 = arith.maximumf %12, %13 : vector<8x128xf32>
    %c0_12 = arith.constant 0 : index
    %c0_13 = arith.constant 0 : index
    %15 = vector.load %arg6[%c0_12, %c0_13] : memref<128x128xf32, #tpu.memory_space<vmem>>, vector<128x128xf32>
    %cst_14 = arith.constant dense<0.000000e+00> : vector<8x128xf32>
    %16 = tpu.matmul %14, %15, %cst_14 {dimension_numbers = #tpu.dot_dimension_numbers<[1], [0], [0], [1], [0, 0, 1, 1], [], []>} : vector<8x128xf32>, vector<128x128xf32>, vector<8x128xf32> -> vector<8x128xf32>
    %c0_15 = arith.constant 0 : index
    %c0_16 = arith.constant 0 : index
    %17 = vector.load %arg7[%c0_15, %c0_16] : memref<1x128xf32, #tpu.memory_space<vmem>>, vector<1x128xf32>
    %18 = vector.broadcast %17 : vector<1x128xf32> to vector<8x128xf32>
    %19 = arith.addf %16, %18 : vector<8x128xf32>
    %20 = tpu.iota {dimensions = array<i32: 1>} : vector<8x128xi32>
    %c4_i32 = arith.constant 4 : i32
    %21 = vector.broadcast %c4_i32 : i32 to vector<8x128xi32>
    %22 = arith.cmpi sge, %20, %21 : vector<8x128xi32>
    %cst_17 = arith.constant -2.000000e+01 : f32
    %cst_18 = arith.constant 2.000000e+00 : f32
    %23 = vector.broadcast %cst_17 : f32 to vector<8x128xf32>
    %24 = arith.maximumf %23, %19 : vector<8x128xf32>
    %25 = vector.broadcast %cst_18 : f32 to vector<8x128xf32>
    %26 = arith.minimumf %25, %24 : vector<8x128xf32>
    %27 = arith.select %22, %26, %19 : vector<8x128xi1>, vector<8x128xf32>
    %c0_19 = arith.constant 0 : index
    %c0_20 = arith.constant 0 : index
    %28 = vector.load %arg8[%c0_19, %c0_20] : memref<8x128xf32, #tpu.memory_space<vmem>>, vector<8x128xf32>
    tpu.vector_store %arg8[%c0_19, %c0_20], %27 {strides = array<i32>} : memref<8x128xf32, #tpu.memory_space<vmem>>, vector<8x128xf32>,
    return
  }
  func.func @transform_0(%arg0: i32) -> (i32, i32) {
    %c0_i32 = arith.constant 0 : i32
    %c0_i32_0 = arith.constant 0 : i32
    return %arg0, %c0_i32 : i32, i32
  }
  func.func @transform_1(%arg0: i32) -> (i32, i32) {
    %c0_i32 = arith.constant 0 : i32
    %c0_i32_0 = arith.constant 0 : i32
    %c0_i32_1 = arith.constant 0 : i32
    return %c0_i32, %c0_i32_0 : i32, i32
  }
  func.func @transform_2(%arg0: i32) -> (i32, i32) {
    %c0_i32 = arith.constant 0 : i32
    %c0_i32_0 = arith.constant 0 : i32
    %c0_i32_1 = arith.constant 0 : i32
    return %c0_i32, %c0_i32_0 : i32, i32
  }
  func.func @transform_3(%arg0: i32) -> (i32, i32) {
    %c0_i32 = arith.constant 0 : i32
    %c0_i32_0 = arith.constant 0 : i32
    %c0_i32_1 = arith.constant 0 : i32
    return %c0_i32, %c0_i32_0 : i32, i32
  }
  func.func @transform_4(%arg0: i32) -> (i32, i32) {
    %c0_i32 = arith.constant 0 : i32
    %c0_i32_0 = arith.constant 0 : i32
    %c0_i32_1 = arith.constant 0 : i32
    return %c0_i32, %c0_i32_0 : i32, i32
  }
  func.func @transform_5(%arg0: i32) -> (i32, i32) {
    %c0_i32 = arith.constant 0 : i32
    %c0_i32_0 = arith.constant 0 : i32
    %c0_i32_1 = arith.constant 0 : i32
    return %c0_i32, %c0_i32_0 : i32, i32
  }
  func.func @transform_6(%arg0: i32) -> (i32, i32) {
    %c0_i32 = arith.constant 0 : i32
    %c0_i32_0 = arith.constant 0 : i32
    %c0_i32_1 = arith.constant 0 : i32
    return %c0_i32, %c0_i32_0 : i32, i32
  }
  func.func @transform_7(%arg0: i32) -> (i32, i32) {
    %c0_i32 = arith.constant 0 : i32
    %c0_i32_0 = arith.constant 0 : i32
    return %arg0, %c0_i32 : i32, i32
  }
}

</mosaic_0001>

<bundles_post_ra>
// kernel: actor_forward.1
= control target key start
LH: loop header
LB: loop body
LE: loop exit
PB: predicated region body
PF: predicated region fallthrough
CT: control target
= control target key end

     0   :  { %12 = vsyncpa [#allocation3], 0  ;;  %s775_s0 = inlined_call_operand.hbm [shape: f32[8,16], index: 0, kind: input, shape index: {}]   ;;  %s776_s1 = inlined_call_operand.hbm [shape: f32[16,128], index: 1, kind: input, shape index: {}]   ;;  %s777_s2 = inlined_call_operand.vmem [shape: f32[1,128], index: 2, kind: input, shape index: {}]   ;;  %s778_s3 = inlined_call_operand.hbm [shape: f32[128,128], index: 3, kind: input, shape index: {}]   ;;  %s779_s4 = inlined_call_operand.vmem [shape: f32[1,128], index: 4, kind: input, shape index: {}]   ;;  %s780_s5 = inlined_call_operand.hbm [shape: f32[128,128], index: 5, kind: input, shape index: {}]   ;;  %s781_s6 = inlined_call_operand.vmem [shape: f32[1,128], index: 6, kind: input, shape index: {}]   ;;  %s782_s7 = inlined_call_operand.vmem [shape: f32[8,128], index: 7, kind: output, shape index: {}]  }
   0x1   :  { %13 = vsyncpa [#allocation5], 0 }
   0x2   :  { %14 = vsyncpa [#allocation8], 0  ;;  %s637_s24 = smov [#allocation4]   ;;  %s543_s28 = scalar_lea.hbm %s776_s1, 256 }
   0x3   :  { %s30_s25 = sshll.u32 %s637_s24, 4  ;;  %p544_p0 = scmp.ne.s32.totalorder %s776_s1, %s543_s28  ;;  %s31_s25 = int_to_ptr.vmem [resolvable:$true] %s30_s25 }
   0x4   :  { %p547_p1 = scmp.lt.u32.totalorder %s543_s28, %s776_s1 }
   0x6   :  { %p549_p2 = pnand %p547_p1, %p544_p0 }
   0x8   :  { %552 = shalt.err (!%p549_p2)
}
   0x9   :  { %s553_s10 = scalar_lea.vmem %s31_s25, 256  ;;  %p558_p4 = scmp.lt.s32.totalorder %s31_s25, %s31_s25 }
   0xa   :  { %p554_p3 = scmp.ne.s32.totalorder %s31_s25, %s553_s10  ;;  %p559_p5 = scmp.lt.s32.totalorder %s553_s10, %s553_s10 }
   0xc   :  { %p560_p6 = por %p559_p5, %p558_p4 }
   0xe   :  { %p561_p7 = pnand %p560_p6, %p554_p3 }
  0x10   :  { %564 = shalt.err (!%p561_p7)
}
  0x11   :  { %s638_s11 = smov 128   ;;  %s639_s12 = smov 8  }
  0x12   :  { %36 = dma.hbm_to_vmem [thread:$0]  %s776_s1, 256, %s31_s25, [#allocation5], %s638_s11, %s638_s11, %s639_s12  }
  0x13   :  { %s640_s15 = smov [#allocation2]   ;;  %s641_s17 = smov [#allocation6]  }
  0x14   :  { %s21_s16 = sshll.u32 %s640_s15, 4  ;;  %s44_s18 = sshll.u32 %s641_s17, 4  ;;  %s22_s16 = int_to_ptr.vmem [resolvable:$true] %s21_s16  ;;  %s45_s18 = int_to_ptr.vmem [resolvable:$true] %s44_s18 }
  0x15   :  { %s565_s21 = scalar_lea.hbm %s775_s0, 128 }
  0x16   :  { %p566_p8 = scmp.ne.s32.totalorder %s775_s0, %s565_s21  ;;  %p569_p9 = scmp.lt.u32.totalorder %s565_s21, %s775_s0 }
  0x18   :  { %p571_p10 = pnand %p569_p9, %p566_p8 }
  0x1a   :  { %574 = shalt.err (!%p571_p10)
}
  0x1b   :  { %s575_s1 = scalar_lea.vmem %s22_s16, 128  ;;  %p580_p12 = scmp.lt.s32.totalorder %s22_s16, %s22_s16 }
  0x1c   :  { %p576_p11 = scmp.ne.s32.totalorder %s22_s16, %s575_s1  ;;  %p581_p13 = scmp.lt.s32.totalorder %s575_s1, %s575_s1 }
  0x1e   :  { %p582_p0 = por %p581_p13, %p580_p12 }
  0x20   :  { %p583_p1 = pnand %p582_p0, %p576_p11 }
  0x22   :  { %586 = shalt.err (!%p583_p1)
}
  0x23   :  { %24 = dma.hbm_to_vmem [thread:$0]  %s775_s0, 128, %s22_s16, [#allocation3]  }
  0x24   :  { %s587_s30 = scalar_lea.hbm %s778_s3, 2048 }
  0x25   :  { %p588_p2 = scmp.ne.s32.totalorder %s778_s3, %s587_s30  ;;  %p591_p3 = scmp.lt.u32.totalorder %s587_s30, %s778_s3 }
  0x27   :  { %p593_p4 = pnand %p591_p3, %p588_p2 }
  0x29   :  { %596 = shalt.err (!%p593_p4)
}
  0x2a   :  { %s597_s14 = scalar_lea.vmem %s45_s18, 2048  ;;  %p602_p6 = scmp.lt.s32.totalorder %s45_s18, %s45_s18 }
  0x2b   :  { %p598_p5 = scmp.ne.s32.totalorder %s45_s18, %s597_s14  ;;  %p603_p7 = scmp.lt.s32.totalorder %s597_s14, %s597_s14 }
  0x2d   :  { %p604_p8 = por %p603_p7, %p602_p6 }
  0x2f   :  { %p605_p9 = pnand %p604_p8, %p598_p5 }
  0x31   :  { %608 = shalt.err (!%p605_p9)
}
  0x32   :  { %50 = dma.hbm_to_vmem [thread:$0]  %s778_s3, 2048, %s45_s18, [#allocation5], %s638_s11, %s638_s11, %s639_s12  }
  0x33   :  { %s642_s16 = smov [#allocation7]   ;;  %s609_s21 = scalar_lea.hbm %s780_s5, 2048 }
  0x34   :  { %s58_s17 = sshll.u32 %s642_s16, 4  ;;  %p610_p10 = scmp.ne.s32.totalorder %s780_s5, %s609_s21  ;;  %s59_s17 = int_to_ptr.vmem [resolvable:$true] %s58_s17 }
  0x35   :  { %p613_p11 = scmp.lt.u32.totalorder %s609_s21, %s780_s5 }
  0x37   :  { %p615_p12 = pnand %p613_p11, %p610_p10 }
  0x39   :  { %618 = shalt.err (!%p615_p12)
}
  0x3a   :  { %s619_s1 = scalar_lea.vmem %s59_s17, 2048  ;;  %p624_p0 = scmp.lt.s32.totalorder %s59_s17, %s59_s17 }
  0x3b   :  { %p620_p13 = scmp.ne.s32.totalorder %s59_s17, %s619_s1  ;;  %p625_p1 = scmp.lt.s32.totalorder %s619_s1, %s619_s1 }
  0x3d   :  { %p626_p2 = por %p625_p1, %p624_p0 }
  0x3f   :  { %p627_p3 = pnand %p626_p2, %p620_p13 }
  0x41   :  { %630 = shalt.err (!%p627_p3)
}
  0x42   :  { %64 = dma.hbm_to_vmem [thread:$0]  %s780_s5, 2048, %s59_s17, [#allocation8], %s638_s11, %s638_s11, %s639_s12  }
  0x43   :  { %631 = dma.done.wait [#allocation3], 128  }
  0x44   :  { %632 = vsyncadd [#allocation3], 4294967168 }
  0x45   :  { %633 = dma.done.wait [#allocation5], 2304  }
  0x46   :  { %634 = vsyncadd [#allocation5], 4294964992 }
  0x47   :  { %635 = dma.done.wait [#allocation8], 2048  }
  0x48   :  { %636 = vsyncadd [#allocation8], 4294965248  ;;  %v643_v0 = vmov 0.0|0.0   ;;  %vm644_vm0 = vmmov 0   ;;  %v645_v1 = vmov 0.0   ;;  %v80_v2 = vld [vmem:[#allocation4] sm:$0xff] }
  0x49   :  { %483 = vmatprep.subr.bf16.mxu0 %v643_v0  ;;  %410 = vmatprep.mubr.msk.f32.mxu0 %vm644_vm0, %v645_v1  ;;  %v81_v3 = vld [vmem:[#allocation4 + $0x8] sm:$0xff]  ;;  %v164_v5 = vld [vmem:[#allocation6] sm:$0xff]  ;;  %v165_v6 = vld [vmem:[#allocation6 + $0x8] sm:$0xff]  ;;  %vm89_vm1 = vcmask 130048  }
  0x4a   :  { %486 = vmatprep.subr.bf16.mxu1 %v643_v0  ;;  %445 = vmatprep.mubr.msk.f32.mxu1 %vm644_vm0, %v645_v1  ;;  %v484_v4 = vpack.c.bf16 %v81_v3, %v80_v2  ;;  %v166_v7 = vld [vmem:[#allocation6 + $0x10] sm:$0xff]  ;;  %v487_v8 = vpack.c.bf16 %v165_v6, %v164_v5  ;;  %v167_v9 = vld [vmem:[#allocation6 + $0x18] sm:$0xff]  ;;  %v79_v10 = vld [vmem:[#allocation2] sm:$0xff] }
  0x4b   :  { %v490_v11 = vpack.c.bf16 %v167_v9, %v166_v7  ;;  %v168_v12 = vld [vmem:[#allocation6 + $0x20] sm:$0xff]  ;;  %v169_v13 = vld [vmem:[#allocation6 + $0x28] sm:$0xff]  ;;  %v170_v15 = vld [vmem:[#allocation6 + $0x30] sm:$0xff] }
  0x4c   :  { %485 = vmatpush3.bf16.msra.mxu0 %v484_v4  ;;  %488 = vmatpush3.bf16.msra.mxu1 %v487_v8  ;;  %v493_v14 = vpack.c.bf16 %v169_v13, %v168_v12  ;;  %v171_v16 = vld [vmem:[#allocation6 + $0x38] sm:$0xff]  ;;  %v172_v18 = vld [vmem:[#allocation6 + $0x40] sm:$0xff]  ;;  %v173_v19 = vld [vmem:[#allocation6 + $0x48] sm:$0xff] }
  0x4d   :  { %510 = vmatprep.subr.bf16.mxu0 %v643_v0  ;;  %489 = vmatprep.subr.bf16.mxu1 %v643_v0  ;;  %v496_v17 = vpack.c.bf16 %v171_v16, %v170_v15  ;;  %v499_v20 = vpack.c.bf16 %v173_v19, %v172_v18  ;;  %v174_v21 = vld [vmem:[#allocation6 + $0x50] sm:$0xff]  ;;  %v175_v22 = vld [vmem:[#allocation6 + $0x58] sm:$0xff]  ;;  %v176_v24 = vld [vmem:[#allocation6 + $0x60] sm:$0xff] }
  0x4e   :  { %v502_v23 = vpack.c.bf16 %v175_v22, %v174_v21  ;;  %v177_v25 = vld [vmem:[#allocation6 + $0x68] sm:$0xff]  ;;  %v178_v27 = vld [vmem:[#allocation6 + $0x70] sm:$0xff]  ;;  %v179_v28 = vld [vmem:[#allocation6 + $0x78] sm:$0xff] }
  0x4f   :  { %411 = vmatmul.mubr.msk.f32.vlgmr.msra.gmra.mrb[0].mxu0 %vm89_vm1, %v79_v10  ;;  %v505_v26 = vpack.c.bf16 %v177_v25, %v176_v24  ;;  %v508_v29 = vpack.c.bf16 %v179_v28, %v178_v27  ;;  %v258_v30 = vld [vmem:[#allocation7] sm:$0xff]  ;;  %v259_v31 = vld [vmem:[#allocation7 + $0x8] sm:$0xff]  ;;  %v260_v32 = vld [vmem:[#allocation7 + $0x10] sm:$0xff] }
  0x50   :  { %480 = vmatprep.mubr.msk.f32.mxu0 %vm644_vm0, %v645_v1  ;;  %491 = vmatpush3.bf16.msra.mxu1 %v490_v11  ;;  %v511_v33 = vpack.c.bf16 %v259_v31, %v258_v30  ;;  %v261_v34 = vld [vmem:[#allocation7 + $0x18] sm:$0xff]  ;;  %v262_v36 = vld [vmem:[#allocation7 + $0x20] sm:$0xff]  ;;  %v263_v37 = vld [vmem:[#allocation7 + $0x28] sm:$0xff] }
  0x51   :  { %492 = vmatprep.subr.bf16.mxu1 %v643_v0  ;;  %v514_v35 = vpack.c.bf16 %v261_v34, %v260_v32  ;;  %v517_v38 = vpack.c.bf16 %v263_v37, %v262_v36  ;;  %v264_v39 = vld [vmem:[#allocation7 + $0x30] sm:$0xff]  ;;  %v265_v40 = vld [vmem:[#allocation7 + $0x38] sm:$0xff]  ;;  %v266_v42 = vld [vmem:[#allocation7 + $0x40] sm:$0xff] }
  0x52   :  { %512 = vmatpush3.bf16.msra.mxu0 %v511_v33  ;;  %v520_v41 = vpack.c.bf16 %v265_v40, %v264_v39  ;;  %v267_v43 = vld [vmem:[#allocation7 + $0x48] sm:$0xff]  ;;  %v268_v45 = vld [vmem:[#allocation7 + $0x50] sm:$0xff]  ;;  %v269_v46 = vld [vmem:[#allocation7 + $0x58] sm:$0xff] }
  0x53   :  { %513 = vmatprep.subr.bf16.mxu0 %v643_v0  ;;  %v523_v44 = vpack.c.bf16 %v267_v43, %v266_v42  ;;  %v526_v47 = vpack.c.bf16 %v269_v46, %v268_v45  ;;  %v270_v48 = vld [vmem:[#allocation7 + $0x60] sm:$0xff]  ;;  %v271_v49 = vld [vmem:[#allocation7 + $0x68] sm:$0xff]  ;;  %v272_v56 = vld [vmem:[#allocation7 + $0x70] sm:$0xff] }
  0x54   :  { %494 = vmatpush3.bf16.msra.mxu1 %v493_v14  ;;  %v529_v50 = vpack.c.bf16 %v271_v49, %v270_v48  ;;  %v365_v51 = vld [vmem:[%s777_s2] ss:$0 sm:$0xff]  ;;  %v273_v57 = vld [vmem:[#allocation7 + $0x78] sm:$0xff] }
  0x55   :  { %495 = vmatprep.subr.bf16.mxu1 %v643_v0  ;;  %v532_v58 = vpack.c.bf16 %v273_v57, %v272_v56  ;;  %v367_v59 = vld [vmem:[%s779_s4] ss:$0 sm:$0xff] }
  0x56   :  { %515 = vmatpush3.bf16.msra.mxu0 %v514_v35  ;;  %v368_v1 = vld [vmem:[%s781_s6] ss:$0 sm:$0xff] }
  0x57   :  { %516 = vmatprep.subr.bf16.mxu0 %v643_v0 }
  0x58   :  { %497 = vmatpush3.bf16.msra.mxu1 %v496_v17 }
  0x59   :  { %498 = vmatprep.subr.bf16.mxu1 %v643_v0 }
  0x5a   :  { %518 = vmatpush3.bf16.msra.mxu0 %v517_v38 }
  0x5b   :  { %519 = vmatprep.subr.bf16.mxu0 %v643_v0 }
  0x5c   :  { %500 = vmatpush3.bf16.msra.mxu1 %v499_v20 }
  0x5d   :  { %501 = vmatprep.subr.bf16.mxu1 %v643_v0 }
  0x5e   :  { %521 = vmatpush3.bf16.msra.mxu0 %v520_v41 }
  0x5f   :  { %522 = vmatprep.subr.bf16.mxu0 %v643_v0 }
  0x60   :  { %503 = vmatpush3.bf16.msra.mxu1 %v502_v23 }
  0x61   :  { %504 = vmatprep.subr.bf16.mxu1 %v643_v0 }
  0x62   :  { %524 = vmatpush3.bf16.msra.mxu0 %v523_v44 }
  0x63   :  { %525 = vmatprep.subr.bf16.mxu0 %v643_v0 }
  0x64   :  { %506 = vmatpush3.bf16.msra.mxu1 %v505_v26 }
  0x65   :  { %507 = vmatprep.subr.bf16.mxu1 %v643_v0 }
  0x66   :  { %527 = vmatpush3.bf16.msra.mxu0 %v526_v47 }
  0x67   :  { %528 = vmatprep.subr.bf16.mxu0 %v643_v0 }
  0x68   :  { %509 = vmatpush3.bf16.msra.mxu1 %v508_v29 }
  0x6a   :  { %530 = vmatpush3.bf16.msra.mxu0 %v529_v50 }
  0x6b   :  { %531 = vmatprep.subr.bf16.mxu0 %v643_v0  ;;  %v351_v0 = vlaneseq }
  0x6d   :  { %v352_v3 = vand.u32 127, %v351_v0 }
  0x6e   :  { %533 = vmatpush3.bf16.msra.mxu0 %v532_v58 }
  0x6f   :  { %vm353_vm2 = vcmp.ge.s32.totalorder %v352_v3, 4 }
 0x122   :  { %v159_v52 = vpop.f32.mrb[0].mxu0 }
 0x123   :  { %v160_v53 = vadd.f32 %v365_v51, %v159_v52  ;;  %v412_v54 = vpop.f32.mrb[1].mxu0 }
 0x125   :  { %v163_v55 = vmax.f32 %v160_v53, 0.0 }
 0x127   :  { %446 = vmatmul.mubr.f32.vlgmr.msra.gmra.mrb[0].mxu1 %v163_v55 }
 0x1fa   :  { %v253_v60 = vpop.f32.mrb[0].mxu1 }
 0x1fb   :  { %v254_v61 = vadd.f32 %v367_v59, %v253_v60  ;;  %v447_v62 = vpop.f32.mrb[1].mxu1 }
 0x1fd   :  { %v257_v63 = vmax.f32 %v254_v61, 0.0 }
 0x1ff   :  { %481 = vmatmul.mubr.f32.vlgmr.msra.gmra.mrb[2].mxu0 %v257_v63 }
 0x2d2   :  { %v347_v2 = vpop.f32.mrb[2].mxu0 }
 0x2d3   :  { %v348_v4 = vadd.f32 %v368_v1, %v347_v2  ;;  %v482_v5 = vpop.f32.mrb[3].mxu0 }
 0x2d5   :  { %v354_v6 = vmax.f32 %v348_v4, -20.0 }
 0x2d7   :  { %v355_v7 = vmin.f32 %v354_v6, 2.0 }
 0x2d9   :  { %v356_v8 = vsel %vm353_vm2, %v355_v7, %v348_v4 }
 0x2da   :  { %357 = vst [vmem:[%s782_s7] sm:$0xff] %v356_v8 }
 0x2db   :  { %362 = vsyncpa [#allocation3], 1 }
 0x2dc   :  { %363 = vsyncpa [#allocation5], 1 }
 0x2dd   :  { %364 = vsyncpa [#allocation8], 1 }

</bundles_post_ra>
